<compile_context>
chip_gen: v7x
topology: tpu7x:2x2x1
jax: 0.10.0
libtpu: 0.0.40
codegen_flags: <defaults>
</compile_context>

<pallas_src>
import math

import jax
import jax.numpy as jnp
from jax.experimental import pallas as pl
from jax.experimental.pallas import tpu as pltpu


def _learnable_sigmoid_kernel(x_ref, slope_ref, beta_ref, o_ref):
    # Pure elementwise: VPU mul + single EUP tanh; bottleneck is the HBM stream.
    x = x_ref[...].astype(jnp.float32)          # (TR, Fk)
    s = slope_ref[...].astype(jnp.float32)      # (1, Fk) -> broadcast over rows
    beta = beta_ref[0, 0]                       # SMEM scalar (f32)
    z = s * x
    # sigmoid(z) == 0.5*tanh(0.5*z) + 0.5  -> one EUP push per element.
    y = beta * (0.5 * jnp.tanh(0.5 * z) + 0.5)
    o_ref[...] = y.astype(o_ref.dtype)


def _tiling_params():
    """Pick (target_block_bytes, vmem_limit_bytes) per TPU generation."""
    try:
        vmem = int(pltpu.get_tpu_info().vmem_capacity_bytes)
    except Exception:
        vmem = None
    if vmem is not None and vmem <= 96 * 1024 * 1024:
        # v7x-class: 64 MiB VMEM per TC -> 6 MiB blocks, 48 MiB scoped limit.
        return 6 * 1024 * 1024, 48 * 1024 * 1024
    if vmem is not None:
        # v5e / v6e: 128 MiB physical VMEM -> 8 MiB blocks, 64 MiB limit.
        return 8 * 1024 * 1024, 64 * 1024 * 1024
    # Unknown hardware: conservative (fits any generation's scoped VMEM).
    return 4 * 1024 * 1024, 32 * 1024 * 1024


def learnable_sigmoid(x, slope, beta=1.0):
    """x: (..., in_features); slope: (in_features,).
    Computes beta * sigmoid(slope * x) with slope broadcast over leading dims."""
    orig_shape = x.shape
    in_features = orig_shape[-1]
    assert slope.shape == (in_features,)

    rows = 1
    for d in orig_shape[:-1]:
        rows *= d

    # --- Lane folding: fold k consecutive rows into the lane axis so the lane
    # dim is a multiple of 128 (slope simply repeats per lane group). Only do
    # it when it needs no padding (rows % k == 0) and stays within a few vregs.
    if in_features % 128 == 0:
        k = 1
    else:
        k = 128 // math.gcd(in_features, 128)
        if in_features * k > 2048 or k == 0 or rows % k != 0:
            k = 1
    feat_k = in_features * k
    rows_folded = rows // k

    x2d = x.reshape(rows_folded, feat_k)
    slope_k = jnp.tile(slope, k).reshape(1, feat_k)
    beta_arr = jnp.full((1, 1), beta, dtype=jnp.float32)

    # --- Row tile: ~block-size bytes per block, multiple of 8 sublanes -------
    target_block_bytes, vmem_limit = _tiling_params()
    itemsize = jnp.dtype(x.dtype).itemsize
    row_bytes = feat_k * itemsize
    tr_cap = max(8, (target_block_bytes // row_bytes) // 8 * 8)

    if rows_folded <= tr_cap:
        tr = rows_folded                       # single full-extent block
        grid = (1,)
    else:
        tr = tr_cap                            # multiple of 8; partial last
        grid = (pl.cdiv(rows_folded, tr),)     # block handled by Pallas

    out2d = pl.pallas_call(
        _learnable_sigmoid_kernel,
        out_shape=jax.ShapeDtypeStruct((rows_folded, feat_k), x.dtype),
        grid_spec=pltpu.PrefetchScalarGridSpec(
            num_scalar_prefetch=0,
            grid=grid,
            in_specs=[
                pl.BlockSpec((tr, feat_k), lambda i: (i, 0)),
                pl.BlockSpec((1, feat_k), lambda i: (0, 0)),      # slope resident
                pl.BlockSpec(memory_space=pltpu.MemorySpace.SMEM),  # beta scalar
            ],
            out_specs=pl.BlockSpec((tr, feat_k), lambda i: (i, 0)),
        ),
        compiler_params=pltpu.CompilerParams(
            dimension_semantics=("parallel",),
            vmem_limit_bytes=vmem_limit,
        ),
    )(x2d, slope_k, beta_arr)

    return out2d.reshape(orig_shape)


def learnable_sigmoid_ref(x, slope, beta=1.0):
    return beta * jax.nn.sigmoid(slope * x)


if __name__ == "__main__":
    key = jax.random.PRNGKey(0)
    batch, seq, in_features = 2, 8, 32
    beta = 1.0

    # Matches nn.Parameter(torch.ones(in_features)).
    slope = jnp.ones((in_features,), dtype=jnp.float32)
    x = jax.random.normal(key, (batch, seq, in_features), dtype=jnp.float32)

    out = learnable_sigmoid(x, slope, beta)
    out = jax.block_until_ready(out)

    ref = learnable_sigmoid_ref(x, slope, beta)
    assert out.shape == x.shape and out.dtype == x.dtype
    assert jnp.allclose(out, ref, atol=1e-5, rtol=1e-5)

    # Larger, fold-friendly but tile-exercising shape (no padding, cdiv grid).
    x_big = jax.random.normal(key, (3, 1000, in_features), dtype=jnp.float32)
    out_big = jax.block_until_ready(learnable_sigmoid(x_big, slope, beta))
    assert jnp.allclose(out_big, learnable_sigmoid_ref(x_big, slope, beta),
                        atol=1e-5, rtol=1e-5)

    # Shape where rows is not a multiple of the fold factor (falls back k=1,
    # partial-lane stores) to cover the non-folded path.
    x_odd = jax.random.normal(key, (5, 7, in_features), dtype=jnp.float32)
    out_odd = jax.block_until_ready(learnable_sigmoid(x_odd, slope, beta))
    assert jnp.allclose(out_odd, learnable_sigmoid_ref(x_odd, slope, beta),
                        atol=1e-5, rtol=1e-5)

    print("KERNEL_OK")
</pallas_src>

<mosaic_0001>
module attributes {stable_mosaic.version = 11 : i64} {
  func.func @_learnable_sigmoid_kernel(%arg0: i32, %arg1: memref<4x128xf32, #tpu.memory_space<vmem>>, %arg2: memref<1x128xf32, #tpu.memory_space<vmem>>, %arg3: memref<1x1xf32, #tpu.memory_space<smem>>, %arg4: memref<4x128xf32, #tpu.memory_space<vmem>>) attributes {dimension_semantics = [#tpu.dimension_semantics<parallel>], iteration_bounds = array<i64: 1>, scalar_prefetch = 0 : i64, scratch_operands = 0 : i64, tpu.core_type = #tpu.core_type<tc>, window_params = [{transform_indices = @transform_0, window_bounds = array<i64: 4, 128>}, {pipeline_mode = #tpu.pipeline_mode<synchronous>, transform_indices = @transform_1, window_bounds = array<i64: 1, 128>}, {transform_indices = @transform_2, window_bounds = array<i64: 1, 1>}, {transform_indices = @transform_3, window_bounds = array<i64: 4, 128>}]} {
    %c0 = arith.constant 0 : index
    %c0_0 = arith.constant 0 : index
    %0 = vector.load %arg1[%c0, %c0_0] : memref<4x128xf32, #tpu.memory_space<vmem>>, vector<4x128xf32>
    %c0_1 = arith.constant 0 : index
    %c0_2 = arith.constant 0 : index
    %1 = vector.load %arg2[%c0_1, %c0_2] : memref<1x128xf32, #tpu.memory_space<vmem>>, vector<1x128xf32>
    %c0_3 = arith.constant 0 : index
    %c0_4 = arith.constant 0 : index
    %2 = memref.load %arg3[%c0_3, %c0_4] : memref<1x1xf32, #tpu.memory_space<smem>>
    %3 = vector.broadcast %1 : vector<1x128xf32> to vector<4x128xf32>
    %4 = arith.mulf %3, %0 : vector<4x128xf32>
    %cst = arith.constant 5.000000e-01 : f32
    %5 = vector.broadcast %cst : f32 to vector<4x128xf32>
    %6 = arith.mulf %5, %4 : vector<4x128xf32>
    %7 = math.tanh %6 : vector<4x128xf32>
    %cst_5 = arith.constant 5.000000e-01 : f32
    %8 = vector.broadcast %cst_5 : f32 to vector<4x128xf32>
    %9 = arith.mulf %8, %7 : vector<4x128xf32>
    %cst_6 = arith.constant 5.000000e-01 : f32
    %10 = vector.broadcast %cst_6 : f32 to vector<4x128xf32>
    %11 = arith.addf %9, %10 : vector<4x128xf32>
    %12 = vector.broadcast %2 : f32 to vector<4x128xf32>
    %13 = arith.mulf %12, %11 : vector<4x128xf32>
    %c0_7 = arith.constant 0 : index
    %c0_8 = arith.constant 0 : index
    %14 = vector.load %arg4[%c0_7, %c0_8] : memref<4x128xf32, #tpu.memory_space<vmem>>, vector<4x128xf32>
    tpu.vector_store %arg4[%c0_7, %c0_8], %13 {strides = array<i32>} : memref<4x128xf32, #tpu.memory_space<vmem>>, vector<4x128xf32>,
    return
  }
  func.func @transform_0(%arg0: i32) -> (i32, i32) {
    %c0_i32 = arith.constant 0 : i32
    %c0_i32_0 = arith.constant 0 : i32
    return %arg0, %c0_i32 : i32, i32
  }
  func.func @transform_1(%arg0: i32) -> (i32, i32) {
    %c0_i32 = arith.constant 0 : i32
    %c0_i32_0 = arith.constant 0 : i32
    %c0_i32_1 = arith.constant 0 : i32
    return %c0_i32, %c0_i32_0 : i32, i32
  }
  func.func @transform_2(%arg0: i32) -> (i32, i32) {
    %c0_i32 = arith.constant 0 : i32
    %c0_i32_0 = arith.constant 0 : i32
    %c0_i32_1 = arith.constant 0 : i32
    return %c0_i32, %c0_i32_0 : i32, i32
  }
  func.func @transform_3(%arg0: i32) -> (i32, i32) {
    %c0_i32 = arith.constant 0 : i32
    %c0_i32_0 = arith.constant 0 : i32
    return %arg0, %c0_i32 : i32, i32
  }
}

</mosaic_0001>

<bundles_post_ra>
// kernel: tpu_custom_call.1
= control target key start
LH: loop header
LB: loop body
LE: loop exit
PB: predicated region body
PF: predicated region fallthrough
CT: control target
= control target key end

     0   :  { %9 = vsyncpa [#allocation4], 0  ;;  %s165_s0 = inlined_call_operand.hbm [shape: f32[4,128], index: 0, kind: input, shape index: {}]   ;;  %s166_s1 = inlined_call_operand.vmem [shape: f32[1,128], index: 1, kind: input, shape index: {}]   ;;  %s167_s2 = inlined_call_operand.<no memory space> [shape: f32[1,1], index: 2, kind: input, shape index: {}]   ;;  %s168_s3 = inlined_call_operand.hbm [shape: f32[4,128], index: 3, kind: output, shape index: {}]  }
   0x1   :  { %10 = vsyncpa [#allocation5], 0  ;;  %s113_s12 = smov [#allocation3]   ;;  %s65_s16 = scalar_lea.hbm %s165_s0, 64 }
   0x2   :  { %s17_s13 = sshll.u32 %s113_s12, 4  ;;  %p66_p0 = scmp.ne.s32.totalorder %s165_s0, %s65_s16  ;;  %s18_s13 = int_to_ptr.vmem [resolvable:$true] %s17_s13 }
   0x3   :  { %p69_p1 = scmp.lt.u32.totalorder %s65_s16, %s165_s0 }
   0x5   :  { %p71_p2 = pnand %p69_p1, %p66_p0 }
   0x7   :  { %74 = shalt.err (!%p71_p2)
}
   0x8   :  { %s75_s21 = scalar_lea.vmem %s18_s13, 64  ;;  %p80_p4 = scmp.lt.s32.totalorder %s18_s13, %s18_s13 }
   0x9   :  { %p76_p3 = scmp.ne.s32.totalorder %s18_s13, %s75_s21  ;;  %p81_p5 = scmp.lt.s32.totalorder %s75_s21, %s75_s21 }
   0xb   :  { %p82_p6 = por %p81_p5, %p80_p4 }
   0xd   :  { %p83_p7 = pnand %p82_p6, %p76_p3 }
   0xf   :  { %86 = shalt.err (!%p83_p7)
}
  0x10   :  { %20 = dma.hbm_to_vmem [thread:$0]  %s165_s0, 64, %s18_s13, [#allocation4]  }
  0x11   :  { %109 = dma.done.wait [#allocation4], 64  }
  0x12   :  { %110 = vsyncadd [#allocation4], 4294967232  ;;  %v28_v0 = vld [vmem:[#allocation3] sm:$0xf]  ;;  %v42_v6 = vstv %s167_s2  ;;  %s114_s28 = smov [#allocation6]  }
  0x13   :  { %v60_v1 = vld [vmem:[%s166_s1] ss:$0 sm:$0xff]  ;;  %s51_s29 = sshll.u32 %s114_s28, 4  ;;  %s52_s29 = int_to_ptr.vmem [resolvable:$true] %s51_s29 }
  0x14   :  { %v37_v2 = vmul.f32 %v60_v1, %v28_v0  ;;  %s87_s0 = scalar_lea.vmem %s52_s29, 64  ;;  %p92_p9 = scmp.lt.s32.totalorder %s52_s29, %s52_s29 }
  0x15   :  { %p88_p8 = scmp.ne.s32.totalorder %s52_s29, %s87_s0  ;;  %p93_p10 = scmp.lt.s32.totalorder %s87_s0, %s87_s0 }
  0x16   :  { %v38_v3 = vmul.f32 0.5, %v37_v2 }
  0x17   :  { %p94_p11 = por %p93_p10, %p92_p9 }
  0x18   :  { %63 = vtanh.f32 %v38_v3 }
  0x19   :  { %p95_p12 = pnand %p94_p11, %p88_p8 }
  0x22   :  { %v64_v4 = vpop.eup %63 }
  0x23   :  { %v40_v5 = vmul.f32 0.5, %v64_v4 }
  0x25   :  { %v41_v7 = vadd.f32 0.5, %v40_v5 }
  0x27   :  { %v43_v8 = vmul.f32 %v42_v6, %v41_v7 }
  0x29   :  { %44 = vst [vmem:[#allocation6] sm:$0xf] %v43_v8 }
  0x2a   :  { %98 = shalt.err (!%p95_p12)
}
  0x2b   :  { %s99_s4 = scalar_lea.hbm %s168_s3, 64 }
  0x2c   :  { %p100_p13 = scmp.ne.s32.totalorder %s168_s3, %s99_s4  ;;  %p103_p0 = scmp.lt.u32.totalorder %s99_s4, %s168_s3 }
  0x2e   :  { %p105_p1 = pnand %p103_p0, %p100_p13 }
  0x30   :  { %108 = shalt.err (!%p105_p1)
}
  0x31   :  { %54 = dma.vmem_to_hbm [thread:$0]  %s52_s29, 64, %s168_s3, [#allocation5]  }
  0x32   :  { %111 = dma.done.wait [#allocation5], 64  }
  0x33   :  { %112 = vsyncadd [#allocation5], 4294967232 }
  0x34   :  { %58 = vsyncpa [#allocation4], 1 }
  0x35   :  { %59 = vsyncpa [#allocation5], 1 }

</bundles_post_ra>
